<compile_context>
chip_gen: v6e
topology: v6e:2x2x1
jax: 0.10.0
libtpu: 0.0.40
codegen_flags: <defaults>
</compile_context>

<pallas_src>
import jax
import jax.numpy as jnp
from jax.experimental import pallas as pl
from jax.experimental.pallas import tpu as pltpu

_LANES = 128


def _add_relu_kernel(a_ref, b_ref, o_ref):
    # VPU elementwise hot path: add + relu on the full block.
    # Scalar 0 avoids materializing a full-tile zero broadcast.
    o_ref[...] = jnp.maximum(a_ref[...] + b_ref[...], 0)


def _min_parallel_blocks() -> int:
    # Best-effort chip sniff: on v7x (2 TensorCores/chip) ask for >=2 parallel
    # grid steps so the second core is not idle.  Falls back to 1 (correct
    # everywhere) if the device kind can't be read.
    try:
        kind = jax.devices()[0].device_kind.lower()
    except Exception:
        return 1
    return 2 if ("v7" in kind or "7x" in kind) else 1


def add_relu(x328: jax.Array, x320: jax.Array) -> jax.Array:
    assert x328.shape == x320.shape and x328.dtype == x320.dtype
    orig_shape = x328.shape
    dtype = x328.dtype
    n = x328.size
    itemsize = jnp.dtype(dtype).itemsize
    # Sublane packing: 8 rows for 32-bit, 16 for bf16, 32 for int8/fp8.
    sub = 8 * max(1, 4 // itemsize)

    a = x328.reshape(-1)
    b = x320.reshape(-1)

    rem = n % _LANES
    if rem:
        # TODO(synk): a masked tail handled in-kernel would avoid this extra
        # pad/slice HBM pass; never taken for the module's shapes (n % 128 == 0).
        pad = _LANES - rem
        a = jnp.pad(a, (0, pad))
        b = jnp.pad(b, (0, pad))

    R = a.size // _LANES
    a2 = a.reshape(R, _LANES)
    b2 = b.reshape(R, _LANES)

    # Fixed ~2 MiB per-array block: full-width row stripes are contiguous in
    # HBM, 3 arrays x 2 pipeline buffers ~= 12 MiB VMEM (safe on v5e/v6e/v7x).
    target_block_bytes = 2 << 20
    rows_per_block = max(sub, (target_block_bytes // (_LANES * itemsize)) // sub * sub)

    # v7x: split into >=2 parallel steps so both TensorCores issue DMAs.
    min_blocks = _min_parallel_blocks()
    if min_blocks > 1 and R >= 2 * sub:
        rows_cap = max(sub, -(-pl.cdiv(R, min_blocks) // sub) * sub)
        rows_per_block = min(rows_per_block, rows_cap)

    if R <= rows_per_block:
        # Whole slab in one grid step; block == full array dims (any R allowed).
        rows_per_block = R

    grid = (pl.cdiv(R, rows_per_block),)
    block_bytes = rows_per_block * _LANES * itemsize
    # Right-sized VMEM request: 3 arrays x 2 buffers + headroom, capped for v7x.
    vmem_limit = int(min(32 << 20, max(16 << 20, 6 * block_bytes + (2 << 20))))

    out2 = pl.pallas_call(
        _add_relu_kernel,
        out_shape=jax.ShapeDtypeStruct((R, _LANES), dtype),
        grid_spec=pltpu.PrefetchScalarGridSpec(
            num_scalar_prefetch=0,
            grid=grid,
            in_specs=[
                pl.BlockSpec((rows_per_block, _LANES), lambda i: (i, 0)),
                pl.BlockSpec((rows_per_block, _LANES), lambda i: (i, 0)),
            ],
            out_specs=pl.BlockSpec((rows_per_block, _LANES), lambda i: (i, 0)),
        ),
        compiler_params=pltpu.CompilerParams(
            dimension_semantics=("parallel",),
            vmem_limit_bytes=vmem_limit,
        ),
    )(a2, b2)

    out = out2.reshape(-1)
    if rem:
        out = out[:n]
    return out.reshape(orig_shape)


if __name__ == "__main__":
    key = jax.random.PRNGKey(0)
    k1, k2 = jax.random.split(key)
    # Small NCHW shapes consistent with the module's (1, 1024, 14, 14) inputs.
    shape = (2, 4, 16, 16)
    x328 = jax.random.normal(k1, shape, dtype=jnp.float32)
    x320 = jax.random.normal(k2, shape, dtype=jnp.float32)

    out = add_relu(x328, x320)
    jax.block_until_ready(out)

    # Correctness check against plain JAX reference.
    ref = jnp.maximum(x328 + x320, 0.0)
    assert out.shape == shape
    assert jnp.allclose(out, ref, atol=1e-6), "mismatch vs reference"
    print("KERNEL_OK")
</pallas_src>

<mosaic_0001>
module attributes {stable_mosaic.version = 11 : i64} {
  func.func @_add_relu_kernel(%arg0: i32, %arg1: memref<16x128xf32, #tpu.memory_space<vmem>>, %arg2: memref<16x128xf32, #tpu.memory_space<vmem>>, %arg3: memref<16x128xf32, #tpu.memory_space<vmem>>) attributes {dimension_semantics = [#tpu.dimension_semantics<parallel>], iteration_bounds = array<i64: 1>, scalar_prefetch = 0 : i64, scratch_operands = 0 : i64, tpu.core_type = #tpu.core_type<tc>, window_params = [{transform_indices = @transform_0, window_bounds = array<i64: 16, 128>}, {transform_indices = @transform_1, window_bounds = array<i64: 16, 128>}, {transform_indices = @transform_2, window_bounds = array<i64: 16, 128>}]} {
    %c0 = arith.constant 0 : index
    %c0_0 = arith.constant 0 : index
    %0 = vector.load %arg1[%c0, %c0_0] : memref<16x128xf32, #tpu.memory_space<vmem>>, vector<16x128xf32>
    %c0_1 = arith.constant 0 : index
    %c0_2 = arith.constant 0 : index
    %1 = vector.load %arg2[%c0_1, %c0_2] : memref<16x128xf32, #tpu.memory_space<vmem>>, vector<16x128xf32>
    %2 = arith.addf %0, %1 : vector<16x128xf32>
    %cst = arith.constant 0.000000e+00 : f32
    %3 = vector.broadcast %cst : f32 to vector<16x128xf32>
    %4 = arith.maximumf %2, %3 : vector<16x128xf32>
    %c0_3 = arith.constant 0 : index
    %c0_4 = arith.constant 0 : index
    %5 = vector.load %arg3[%c0_3, %c0_4] : memref<16x128xf32, #tpu.memory_space<vmem>>, vector<16x128xf32>
    tpu.vector_store %arg3[%c0_3, %c0_4], %4 {strides = array<i32>} : memref<16x128xf32, #tpu.memory_space<vmem>>, vector<16x128xf32>,
    return
  }
  func.func @transform_0(%arg0: i32) -> (i32, i32) {
    %c0_i32 = arith.constant 0 : i32
    %c0_i32_0 = arith.constant 0 : i32
    return %arg0, %c0_i32 : i32, i32
  }
  func.func @transform_1(%arg0: i32) -> (i32, i32) {
    %c0_i32 = arith.constant 0 : i32
    %c0_i32_0 = arith.constant 0 : i32
    return %arg0, %c0_i32 : i32, i32
  }
  func.func @transform_2(%arg0: i32) -> (i32, i32) {
    %c0_i32 = arith.constant 0 : i32
    %c0_i32_0 = arith.constant 0 : i32
    return %arg0, %c0_i32 : i32, i32
  }
}

</mosaic_0001>

<bundles_post_ra>
// kernel: tpu_custom_call.1
= control target key start
LH: loop header
LB: loop body
LE: loop exit
PB: predicated region body
PF: predicated region fallthrough
CT: control target
= control target key end

     0   :  { %7 = vsyncpa [#allocation3], 0  ;;  %s177_s0 = inlined_call_operand.hbm [shape: f32[16,128], index: 0, kind: input, shape index: {}]   ;;  %s178_s1 = inlined_call_operand.hbm [shape: f32[16,128], index: 1, kind: input, shape index: {}]   ;;  %s179_s2 = inlined_call_operand.hbm [shape: f32[16,128], index: 2, kind: output, shape index: {}]  }
   0x1   :  { %8 = vsyncpa [#allocation6], 0 }
   0x2   :  { %9 = vsyncpa [#allocation4], 0  ;;  %s139_s9 = smov [#allocation2]  }
   0x3   :  { %s15_s10 = sshll.u32 %s139_s9, 4  ;;  %s16_s10 = int_to_ptr.vmem [resolvable:$true] %s15_s10 }
   0x4   :  { %s81_s11 = scalar_lea.vmem %s16_s10, 256  ;;  %p86_p1 = scmp.lt.s32.totalorder %s16_s10, %s16_s10 }
   0x5   :  { %p82_p0 = scmp.ne.s32.totalorder %s16_s10, %s81_s11  ;;  %p87_p2 = scmp.lt.s32.totalorder %s81_s11, %s81_s11 }
   0x7   :  { %p88_p3 = por %p87_p2, %p86_p1 }
   0x9   :  { %p89_p4 = pnand %p88_p3, %p82_p0 }
   0xb   :  { %92 = shalt.err (!%p89_p4)
}
   0xc   :  { %s140_s12 = smov 128   ;;  %s141_s13 = smov 8  }
   0xd   :  { %21 = dma.hbm_to_vmem [thread:$0]  %s177_s0, 256, %s16_s10, [#allocation3], %s140_s12, %s140_s12, %s141_s13  }
   0xe   :  { %s142_s16 = smov [#allocation5]  }
   0xf   :  { %s27_s17 = sshll.u32 %s142_s16, 4  ;;  %s28_s17 = int_to_ptr.vmem [resolvable:$true] %s27_s17 }
  0x10   :  { %s101_s18 = scalar_lea.vmem %s28_s17, 256  ;;  %p106_p6 = scmp.lt.s32.totalorder %s28_s17, %s28_s17 }
  0x11   :  { %p102_p5 = scmp.ne.s32.totalorder %s28_s17, %s101_s18  ;;  %p107_p7 = scmp.lt.s32.totalorder %s101_s18, %s101_s18 }
  0x13   :  { %p108_p8 = por %p107_p7, %p106_p6 }
  0x15   :  { %p109_p9 = pnand %p108_p8, %p102_p5 }
  0x17   :  { %112 = shalt.err (!%p109_p9)
}
  0x18   :  { %33 = dma.hbm_to_vmem [thread:$0]  %s178_s1, 256, %s28_s17, [#allocation6], %s140_s12, %s140_s12, %s141_s13  }
  0x19   :  { %133 = dma.done.wait [#allocation3], 256  }
  0x1a   :  { %134 = vsyncadd [#allocation3], 4294967040 }
  0x1b   :  { %135 = dma.done.wait [#allocation6], 256  }
  0x1c   :  { %136 = vsyncadd [#allocation6], 4294967040  ;;  %v40_v0 = vld [vmem:[#allocation2] sm:$0xff]  ;;  %v42_v1 = vld [vmem:[#allocation5] sm:$0xff]  ;;  %s143_s0 = smov [#allocation7]  }
  0x1d   :  { %v41_v2 = vld [vmem:[#allocation2 + $0x8] sm:$0xff]  ;;  %v44_v3 = vadd.f32 %v42_v1, %v40_v0  ;;  %v43_v4 = vld [vmem:[#allocation5 + $0x8] sm:$0xff]  ;;  %s55_s21 = sshll.u32 %s143_s0, 4  ;;  %s56_s21 = int_to_ptr.vmem [resolvable:$true] %s55_s21 }
  0x1e   :  { %v45_v5 = vadd.f32 %v43_v4, %v41_v2  ;;  %s113_s22 = scalar_lea.vmem %s56_s21, 256  ;;  %p118_p11 = scmp.lt.s32.totalorder %s56_s21, %s56_s21 }
  0x1f   :  { %v46_v6 = vmax.f32 %v44_v3, 0.0  ;;  %p114_p10 = scmp.ne.s32.totalorder %s56_s21, %s113_s22  ;;  %p119_p12 = scmp.lt.s32.totalorder %s113_s22, %s113_s22 }
  0x20   :  { %v47_v7 = vmax.f32 %v45_v5, 0.0 }
  0x21   :  { %48 = vst [vmem:[#allocation7] sm:$0xff] %v46_v6  ;;  %p120_p13 = por %p119_p12, %p118_p11 }
  0x22   :  { %49 = vst [vmem:[#allocation7 + $0x8] sm:$0xff] %v47_v7 }
  0x23   :  { %p121_p0 = pnand %p120_p13, %p114_p10 }
  0x25   :  { %124 = shalt.err (!%p121_p0)
}
  0x26   :  { %61 = dma.vmem_to_hbm [thread:$0]  %s56_s21, 256, %s179_s2, [#allocation4], %s140_s12, %s140_s12, %s141_s13  }
  0x27   :  { %137 = dma.done.wait [#allocation4], 256  }
  0x28   :  { %138 = vsyncadd [#allocation4], 4294967040 }
  0x29   :  { %65 = vsyncpa [#allocation3], 1 }
  0x2a   :  { %66 = vsyncpa [#allocation6], 1 }
  0x2b   :  { %67 = vsyncpa [#allocation4], 1 }

</bundles_post_ra>
